<compile_context>
chip_gen: v5e
topology: v5e:2x2
jax: 0.10.0
libtpu: 0.0.40
codegen_flags: <defaults>
</compile_context>

<pallas_src>
import jax
import jax.numpy as jnp
from jax.experimental import pallas as pl
from jax.experimental.pallas import tpu as pltpu

_LANE = 128
_SUBLANE = 8
# Per-tile byte cap. in+out specs each double-buffer -> ~4x this in VMEM
# (16 MiB), which fits every generation's scoped VMEM once raised to 32 MiB.
_MAX_BLOCK_BYTES = 4 * 1024 * 1024


def _copy_kernel(x_ref, o_ref):
    # Elementwise copy of the current lane-dense 2D tile.
    o_ref[...] = x_ref[...]


def _lane_dense_2d(total: int):
    """Pick (rows, cols) with cols a multiple of 128 dividing total; prefer wide."""
    for cols in (2048, 1024, 512, 256, 128):
        if total % cols == 0:
            return total // cols, cols
    return None


def _identity_pallas(x2: jax.Array) -> jax.Array:
    rows, cols = x2.shape
    itemsize = x2.dtype.itemsize
    total_bytes = rows * cols * itemsize

    if total_bytes <= _MAX_BLOCK_BYTES:
        # Small input: whole array as a single VMEM block, no grid loop.
        return pl.pallas_call(
            _copy_kernel,
            out_shape=jax.ShapeDtypeStruct(x2.shape, x2.dtype),
            input_output_aliases={0: 0},
        )(x2)

    # Large input: tile rows with (8,128)-aligned, lane-dense blocks.
    target_rows = max(_SUBLANE, _MAX_BLOCK_BYTES // (cols * itemsize))
    target_rows -= target_rows % _SUBLANE
    block_rows = None
    r = target_rows
    while r >= _SUBLANE:
        if rows % r == 0:
            block_rows = r
            break
        r -= _SUBLANE
    if block_rows is None:
        # rows not a multiple of 8: a full-extent block dim is always legal.
        block_rows = rows

    grid = (rows // block_rows,)
    spec = pl.BlockSpec((block_rows, cols), lambda i: (i, 0))
    return pl.pallas_call(
        _copy_kernel,
        out_shape=jax.ShapeDtypeStruct(x2.shape, x2.dtype),
        grid=grid,
        in_specs=[spec],
        out_specs=spec,
        input_output_aliases={0: 0},
        compiler_params=pltpu.CompilerParams(
            dimension_semantics=("parallel",),
            vmem_limit_bytes=32 * 1024 * 1024,
        ),
    )(x2)


def mycnn_forward(x: jax.Array) -> jax.Array:
    """Identity forward of MyCNN as a Pallas TPU kernel.

    Flattens NCHW to a lane-dense 2D slab, runs an aliased in-place copy
    kernel, and restores the original shape. With `donate_argnums=0` at the
    jit boundary this is a metadata-only pass-through.
    """
    orig_shape = x.shape
    total = x.size
    two_d = _lane_dense_2d(total)
    if two_d is None:
        # Total not divisible by 128: (1, total) slab, full-extent block.
        two_d = (1, total)
    x2 = x.reshape(two_d)
    y2 = _identity_pallas(x2)
    return y2.reshape(orig_shape)


if __name__ == "__main__":
    key = jax.random.PRNGKey(0)
    # Small NCHW input consistent with a CNN-style module.
    x = jax.random.normal(key, (2, 4, 16, 16), dtype=jnp.float32)
    x_expected = jnp.copy(x)  # undonated copy for the correctness check

    fwd = jax.jit(mycnn_forward, donate_argnums=0)
    y = fwd(x)  # x is donated; its buffer is reused as the output
    jax.block_until_ready(y)

    assert y.shape == x_expected.shape and y.dtype == x_expected.dtype
    assert bool(jnp.all(y == x_expected))
    print("KERNEL_OK")
</pallas_src>

<mosaic_0001>
module attributes {stable_mosaic.version = 11 : i64} {
  func.func @_copy_kernel(%arg0: memref<1x2048xf32, #tpu.memory_space<vmem>>, %arg1: memref<1x2048xf32, #tpu.memory_space<vmem>>) attributes {dimension_semantics = [], scalar_prefetch = 0 : i64, scratch_operands = 0 : i64, tpu.core_type = #tpu.core_type<tc>} {
    %c0 = arith.constant 0 : index
    %c0_0 = arith.constant 0 : index
    %0 = vector.load %arg0[%c0, %c0_0] : memref<1x2048xf32, #tpu.memory_space<vmem>>, vector<1x2048xf32>
    %c0_1 = arith.constant 0 : index
    %c0_2 = arith.constant 0 : index
    %1 = vector.load %arg1[%c0_1, %c0_2] : memref<1x2048xf32, #tpu.memory_space<vmem>>, vector<1x2048xf32>
    tpu.vector_store %arg1[%c0_1, %c0_2], %0 {strides = array<i32>} : memref<1x2048xf32, #tpu.memory_space<vmem>>, vector<1x2048xf32>,
    return
  }
}

</mosaic_0001>

<bundles_post_ra>
// kernel: mycnn_forward.1
= control target key start
LH: loop header
LB: loop body
LE: loop exit
PB: predicated region body
PF: predicated region fallthrough
CT: control target
= control target key end

     0   :  { %s38_s0 = inlined_call_operand.vmem [shape: f32[1,2048], index: 0, kind: input, shape index: {}, may-alias: {0,1}]   ;;  %s39_s1 = inlined_call_operand.vmem [shape: f32[1,2048], index: 1, kind: output, shape index: {}, may-alias: {0,1}]  }
   0x1   :  { %v8_v0 = vld [vmem:[%s38_s0] sm:$0xff]  ;;  %v9_v1 = vld [vmem:[%s38_s0 + $0x8] sm:$0xff] }
   0x2   :  { %10 = vst [vmem:[%s39_s1] sm:$0xff] %v8_v0 }
   0x3   :  { %11 = vst [vmem:[%s39_s1 + $0x8] sm:$0xff] %v9_v1 }

</bundles_post_ra>
